<compile_context>
chip_gen: v7x
topology: tpu7x:2x2x1
jax: 0.10.0
libtpu: 0.0.40
codegen_flags: <defaults>
</compile_context>

<pallas_src>
import math
import functools

import jax
import jax.numpy as jnp
from jax import lax
from jax.experimental import pallas as pl
from jax.experimental.pallas import tpu as pltpu


# --------------------------------------------------------------------------
# Tiled linear (y = x @ w + b) kernel
# --------------------------------------------------------------------------

def _pick_tile(dim, target, quantum):
    """Largest multiple of `quantum` <= target that divides dim, else full dim."""
    t = min(target, dim)
    t -= t % quantum
    while t >= quantum:
        if dim % t == 0:
            return t
        t -= quantum
    return dim  # full-dim block is always legal


def _linear_kernel(x_ref, w_ref, b_ref, o_ref, acc_ref):
    @pl.when(pl.program_id(2) == 0)
    def _init():
        acc_ref[...] = jnp.zeros_like(acc_ref)

    acc_ref[...] += jnp.dot(
        x_ref[...].astype(jnp.bfloat16),
        w_ref[...].astype(jnp.bfloat16),
        preferred_element_type=jnp.float32,
    )

    @pl.when(pl.program_id(2) == pl.num_programs(2) - 1)
    def _finalize():
        o_ref[...] = (acc_ref[...] + b_ref[...].astype(jnp.float32)).astype(o_ref.dtype)


def linear_bias(x, w_t, bias):
    """x: [..., d_in], w_t: [d_in, d_out] (pre-transposed), bias: [d_out]."""
    lead = x.shape[:-1]
    x2 = x.reshape(-1, x.shape[-1])
    M, K = x2.shape
    N = w_t.shape[1]

    tm = _pick_tile(M, 256, 8)
    tn = _pick_tile(N, 256, 128)
    tk = _pick_tile(K, 512, 128)

    out = pl.pallas_call(
        _linear_kernel,
        out_shape=jax.ShapeDtypeStruct((M, N), x.dtype),
        grid=(M // tm, N // tn, K // tk),
        in_specs=[
            pl.BlockSpec((tm, tk), lambda i, j, k: (i, k)),
            pl.BlockSpec((tk, tn), lambda i, j, k: (k, j)),
            pl.BlockSpec((1, tn), lambda i, j, k: (0, j)),
        ],
        out_specs=pl.BlockSpec((tm, tn), lambda i, j, k: (i, j)),
        scratch_shapes=[pltpu.VMEM((tm, tn), jnp.float32)],
        compiler_params=pltpu.CompilerParams(
            dimension_semantics=("parallel", "parallel", "arbitrary")),
    )(x2, w_t, bias.reshape(1, N))
    return out.reshape(*lead, N)


# --------------------------------------------------------------------------
# Attention core kernel (block of heads per grid step)
# --------------------------------------------------------------------------

def _pick_head_block(h, d_k):
    """Smallest head block whose feature width is a multiple of 128, else all heads."""
    for hb in range(1, h + 1):
        if h % hb == 0 and (hb * d_k) % 128 == 0:
            return hb
    return h


def _mha_kernel(q_ref, k_ref, v_ref, keep_ref, o_ref, *, h_blk, d_k, scale):
    # keep: 1.0 = attend, 0.0 = masked (PyTorch: mask.eq(0) -> -inf then 0 after softmax)
    keep = keep_ref[0].astype(jnp.float32)            # (lm, t2), lm in {1, t1}
    neg_bias = (keep - 1.0) * 1e30                    # 0 where kept, -1e30 where masked

    q_all = (q_ref[0] * scale).astype(jnp.bfloat16)   # (t1, h_blk*d_k), q pre-scaled
    k_all = k_ref[0].astype(jnp.bfloat16)             # (t2, h_blk*d_k)
    v_all = v_ref[0].astype(jnp.bfloat16)             # (t2, h_blk*d_k)

    ctx_parts = []
    for hb in range(h_blk):
        lo = hb * d_k
        qh = q_all[:, lo:lo + d_k]
        kh = k_all[:, lo:lo + d_k]
        vh = v_all[:, lo:lo + d_k]

        # scores = q @ k^T without an explicit transpose
        s = lax.dot_general(qh, kh, (((1,), (1,)), ((), ())),
                            preferred_element_type=jnp.float32)   # (t1, t2)
        s = s + neg_bias

        m = jnp.max(s, axis=-1, keepdims=True)
        e = jnp.exp(s - m)
        denom = jnp.sum(e, axis=-1, keepdims=True)
        p = e * pl.reciprocal(denom, approx=True)
        p = p * keep                                   # masked_fill(mask, 0.0) semantics

        ctx_parts.append(
            jnp.dot(p.astype(jnp.bfloat16), vh, preferred_element_type=jnp.float32))

    out = ctx_parts[0] if h_blk == 1 else jnp.concatenate(ctx_parts, axis=-1)
    o_ref[0] = out.astype(o_ref.dtype)                 # single lane-dense store


def attention_core(q_arr, k_arr, v_arr, keep, h, d_k,
                   q_col0=0, k_col0=0, v_col0=0, out_dtype=None):
    """q_arr: [b, t1, >=d] ; k_arr/v_arr: [b, t2, >=d] ; keep: [b, lm, t2] (bf16).

    q/k/v may be views into one packed QKV tensor: *_col0 give the starting column
    (must be a multiple of the per-step head-block width).
    Returns ctx: [b, t1, h*d_k] in packed (head-major within feature dim) layout.
    """
    b, t1 = q_arr.shape[0], q_arr.shape[1]
    t2 = k_arr.shape[1]
    d = h * d_k
    h_blk = _pick_head_block(h, d_k)
    dcol = h_blk * d_k
    n_hb = h // h_blk
    lm = keep.shape[1]
    assert q_col0 % dcol == 0 and k_col0 % dcol == 0 and v_col0 % dcol == 0
    qb0, kb0, vb0 = q_col0 // dcol, k_col0 // dcol, v_col0 // dcol

    scale = 1.0 / math.sqrt(d_k)
    kernel = functools.partial(_mha_kernel, h_blk=h_blk, d_k=d_k, scale=scale)
    out_dtype = out_dtype or q_arr.dtype

    return pl.pallas_call(
        kernel,
        out_shape=jax.ShapeDtypeStruct((b, t1, d), out_dtype),
        grid=(b, n_hb),
        in_specs=[
            pl.BlockSpec((1, t1, dcol), lambda bi, hi: (bi, 0, qb0 + hi)),
            pl.BlockSpec((1, t2, dcol), lambda bi, hi: (bi, 0, kb0 + hi)),
            pl.BlockSpec((1, t2, dcol), lambda bi, hi: (bi, 0, vb0 + hi)),
            pl.BlockSpec((1, lm, t2), lambda bi, hi: (bi, 0, 0)),
        ],
        out_specs=pl.BlockSpec((1, t1, dcol), lambda bi, hi: (bi, 0, hi)),
        compiler_params=pltpu.CompilerParams(
            dimension_semantics=("parallel", "parallel")),
    )(q_arr, k_arr, v_arr, keep)


# --------------------------------------------------------------------------
# Module wrapper
# --------------------------------------------------------------------------

def _xavier_uniform(key, shape, fan_in, fan_out, dtype=jnp.float32):
    bound = math.sqrt(6.0 / (fan_in + fan_out))
    return jax.random.uniform(key, shape, dtype, minval=-bound, maxval=bound)


class MultiHeadedAttentionPallas:
    def __init__(self, n_head, n_feat, dropout_rate, *, rng_key):
        assert n_feat % n_head == 0
        self.d_k = n_feat // n_head
        self.h = n_head
        self.n_feat = n_feat
        self.dropout_rate = dropout_rate  # TODO(synk): eval-mode only; dropout ignored.

        d = n_feat
        ks = jax.random.split(rng_key, 8)
        bbound = 1.0 / math.sqrt(d)

        def init_w(k):
            return _xavier_uniform(k, (d, d), d, d)          # stored as [d_in, d_out]

        def init_b(k):
            return jax.random.uniform(k, (d,), jnp.float32, -bbound, bbound)

        self.w_q_t, self.b_q = init_w(ks[0]), init_b(ks[1])
        self.w_k_t, self.b_k = init_w(ks[2]), init_b(ks[3])
        self.w_v_t, self.b_v = init_w(ks[4]), init_b(ks[5])
        self.w_out_t, self.b_out = init_w(ks[6]), init_b(ks[7])

        # fused QKV weight for the self-attention fast path: one HBM pass over x
        self.w_qkv_t = jnp.concatenate([self.w_q_t, self.w_k_t, self.w_v_t], axis=1)
        self.b_qkv = jnp.concatenate([self.b_q, self.b_k, self.b_v], axis=0)

    def __call__(self, query, key, value, mask=None, pos_emb=None):
        b, t1, d = query.shape
        t2 = key.shape[1]
        h, d_k = self.h, self.d_k

        # keep-mask: 1 = attend, 0 = masked. bf16 halves mask DMA volume vs f32.
        if mask is None:
            keep = jnp.ones((b, 1, t2), jnp.bfloat16)
        else:
            keep = (jnp.asarray(mask) != 0).astype(jnp.bfloat16)

        if (query is key) and (key is value):
            # fused QKV projection
            qkv = linear_bias(query, self.w_qkv_t, self.b_qkv)      # (b, t1, 3d)
            h_blk = _pick_head_block(h, d_k)
            if (h_blk * d_k) % 128 == 0:
                # attention kernel slices q/k/v straight out of the packed tensor
                ctx = attention_core(qkv, qkv, qkv, keep, h, d_k,
                                     q_col0=0, k_col0=d, v_col0=2 * d,
                                     out_dtype=query.dtype)
            else:
                # small d: split the packed projection (cheap at these sizes)
                ctx = attention_core(qkv[..., :d], qkv[..., d:2 * d], qkv[..., 2 * d:],
                                     keep, h, d_k, out_dtype=query.dtype)
        else:
            q_p = linear_bias(query, self.w_q_t, self.b_q)
            k_p = linear_bias(key, self.w_k_t, self.b_k)
            v_p = linear_bias(value, self.w_v_t, self.b_v)
            ctx = attention_core(q_p, k_p, v_p, keep, h, d_k, out_dtype=query.dtype)

        # ctx is already in the packed [b, t1, h*d_k] layout that linear_out expects
        return linear_bias(ctx, self.w_out_t, self.b_out)


# --------------------------------------------------------------------------
# Pure-JAX reference (mirrors the kernel's bf16-operand / f32-accumulate rounding)
# --------------------------------------------------------------------------

def reference_forward(layer, query, key, value, mask):
    b, t1, d = query.shape
    t2 = key.shape[1]
    h, dk = layer.h, layer.d_k
    bf = jnp.bfloat16

    def lin(x, w_t, bias):
        y = jnp.dot(x.reshape(-1, x.shape[-1]).astype(bf), w_t.astype(bf),
                    preferred_element_type=jnp.float32) + bias[None, :]
        return y.reshape(x.shape[0], -1, w_t.shape[1])

    qp = lin(query, layer.w_q_t, layer.b_q)
    kp = lin(key, layer.w_k_t, layer.b_k)
    vp = lin(value, layer.w_v_t, layer.b_v)

    q4 = qp.reshape(b, t1, h, dk).transpose(0, 2, 1, 3)
    k4 = kp.reshape(b, t2, h, dk).transpose(0, 2, 1, 3)
    v4 = vp.reshape(b, t2, h, dk).transpose(0, 2, 1, 3)

    scale = 1.0 / math.sqrt(dk)
    s = jnp.einsum("bhqd,bhkd->bhqk", (q4 * scale).astype(bf), k4.astype(bf),
                   preferred_element_type=jnp.float32)
    if mask is not None:
        keep = (jnp.asarray(mask) != 0).astype(jnp.float32)[:, None]   # (b,1,lm,t2)
        s = s + (keep - 1.0) * 1e30
        attn = jax.nn.softmax(s, axis=-1) * keep
    else:
        attn = jax.nn.softmax(s, axis=-1)

    ctx = jnp.einsum("bhqk,bhkd->bhqd", attn.astype(bf), v4.astype(bf),
                     preferred_element_type=jnp.float32)
    ctx = ctx.transpose(0, 2, 1, 3).reshape(b, t1, d)
    out = jnp.dot(ctx.reshape(-1, d).astype(bf), layer.w_out_t.astype(bf),
                  preferred_element_type=jnp.float32) + layer.b_out[None, :]
    return out.reshape(b, t1, d)


# --------------------------------------------------------------------------

if __name__ == "__main__":
    n_feat = 32
    n_head = 4
    batch = 2
    t1 = 8
    t2 = 16

    root = jax.random.PRNGKey(0)
    k_param, k_x, k_q, k_kv, k_m1, k_m2 = jax.random.split(root, 6)

    layer = MultiHeadedAttentionPallas(n_head, n_feat, dropout_rate=0.0, rng_key=k_param)

    # --- test 1: self-attention (fused QKV path), (b, t1, t1) mask ---
    x = jax.random.normal(k_x, (batch, t1, n_feat), jnp.float32)
    mask_self = jax.random.bernoulli(k_m1, p=0.8, shape=(batch, t1, t1)).astype(jnp.int32)
    out1 = layer(x, x, x, mask_self)
    ref1 = reference_forward(layer, x, x, x, mask_self)

    # --- test 2: cross-attention (separate projections), (b, 1, t2) mask ---
    q_in = jax.random.normal(k_q, (batch, t1, n_feat), jnp.float32)
    kv_in = jax.random.normal(k_kv, (batch, t2, n_feat), jnp.float32)
    mask_cross = jax.random.bernoulli(k_m2, p=0.8, shape=(batch, 1, t2)).astype(jnp.int32)
    out2 = layer(q_in, kv_in, kv_in, mask_cross)
    ref2 = reference_forward(layer, q_in, kv_in, kv_in, mask_cross)

    # --- test 3: no mask ---
    out3 = layer(q_in, kv_in, kv_in, None)
    ref3 = reference_forward(layer, q_in, kv_in, kv_in, None)

    jax.block_until_ready((out1, out2, out3))

    assert out1.shape == (batch, t1, n_feat)
    assert out2.shape == (batch, t1, n_feat)
    assert out3.shape == (batch, t1, n_feat)
    assert jnp.allclose(out1, ref1, atol=2e-2, rtol=2e-2)
    assert jnp.allclose(out2, ref2, atol=2e-2, rtol=2e-2)
    assert jnp.allclose(out3, ref3, atol=2e-2, rtol=2e-2)

    print("KERNEL_OK")
</pallas_src>

<mosaic_0001>
module attributes {stable_mosaic.version = 11 : i64} {
  func.func @_linear_kernel(%arg0: i32, %arg1: i32, %arg2: i32, %arg3: memref<16x32xf32, #tpu.memory_space<vmem>>, %arg4: memref<32x96xf32, #tpu.memory_space<vmem>>, %arg5: memref<1x96xf32, #tpu.memory_space<vmem>>, %arg6: memref<16x96xf32, #tpu.memory_space<vmem>>, %arg7: memref<16x96xf32, #tpu.memory_space<vmem>>) attributes {dimension_semantics = [#tpu.dimension_semantics<parallel>, #tpu.dimension_semantics<parallel>, #tpu.dimension_semantics<arbitrary>], iteration_bounds = array<i64: 1, 1, 1>, scalar_prefetch = 0 : i64, scratch_operands = 1 : i64, tpu.core_type = #tpu.core_type<tc>, window_params = [{transform_indices = @transform_0, window_bounds = array<i64: 16, 32>}, {transform_indices = @transform_1, window_bounds = array<i64: 32, 96>}, {transform_indices = @transform_2, window_bounds = array<i64: 1, 96>}, {transform_indices = @transform_3, window_bounds = array<i64: 16, 96>}]} {
    %c0_i32 = arith.constant 0 : i32
    %0 = arith.cmpi eq, %arg2, %c0_i32 : i32
    %1 = arith.extui %0 : i1 to i32
    %c0_i32_0 = arith.constant 0 : i32
    %2 = arith.cmpi ne, %1, %c0_i32_0 : i32
    scf.if %2 {
      %cst_10 = arith.constant 0.000000e+00 : f32
      %14 = vector.broadcast %cst_10 : f32 to vector<16x96xf32>
      %c0_11 = arith.constant 0 : index
      %c0_12 = arith.constant 0 : index
      %15 = vector.load %arg7[%c0_11, %c0_12] : memref<16x96xf32, #tpu.memory_space<vmem>>, vector<16x96xf32>
      tpu.vector_store %arg7[%c0_11, %c0_12], %14 {strides = array<i32>} : memref<16x96xf32, #tpu.memory_space<vmem>>, vector<16x96xf32>,
    } else {
    }
    %c0 = arith.constant 0 : index
    %c0_1 = arith.constant 0 : index
    %3 = vector.load %arg7[%c0, %c0_1] : memref<16x96xf32, #tpu.memory_space<vmem>>, vector<16x96xf32>
    %c0_2 = arith.constant 0 : index
    %c0_3 = arith.constant 0 : index
    %4 = vector.load %arg3[%c0_2, %c0_3] : memref<16x32xf32, #tpu.memory_space<vmem>>, vector<16x32xf32>
    %5 = arith.truncf %4 : vector<16x32xf32> to vector<16x32xbf16>
    %c0_4 = arith.constant 0 : index
    %c0_5 = arith.constant 0 : index
    %6 = vector.load %arg4[%c0_4, %c0_5] : memref<32x96xf32, #tpu.memory_space<vmem>>, vector<32x96xf32>
    %7 = arith.truncf %6 : vector<32x96xf32> to vector<32x96xbf16>
    %cst = arith.constant dense<0.000000e+00> : vector<16x96xf32>
    %8 = tpu.matmul %5, %7, %cst {dimension_numbers = #tpu.dot_dimension_numbers<[1], [0], [0], [1], [0, 0, 1, 1], [], []>} : vector<16x32xbf16>, vector<32x96xbf16>, vector<16x96xf32> -> vector<16x96xf32>
    %9 = arith.addf %3, %8 : vector<16x96xf32>
    %c0_6 = arith.constant 0 : index
    %c0_7 = arith.constant 0 : index
    %10 = vector.load %arg7[%c0_6, %c0_7] : memref<16x96xf32, #tpu.memory_space<vmem>>, vector<16x96xf32>
    tpu.vector_store %arg7[%c0_6, %c0_7], %9 {strides = array<i32>} : memref<16x96xf32, #tpu.memory_space<vmem>>, vector<16x96xf32>,
    %c0_i32_8 = arith.constant 0 : i32
    %11 = arith.cmpi eq, %arg2, %c0_i32_8 : i32
    %12 = arith.extui %11 : i1 to i32
    %c0_i32_9 = arith.constant 0 : i32
    %13 = arith.cmpi ne, %12, %c0_i32_9 : i32
    scf.if %13 {
      %c0_10 = arith.constant 0 : index
      %c0_11 = arith.constant 0 : index
      %14 = vector.load %arg7[%c0_10, %c0_11] : memref<16x96xf32, #tpu.memory_space<vmem>>, vector<16x96xf32>
      %c0_12 = arith.constant 0 : index
      %c0_13 = arith.constant 0 : index
      %15 = vector.load %arg5[%c0_12, %c0_13] : memref<1x96xf32, #tpu.memory_space<vmem>>, vector<1x96xf32>
      %16 = vector.broadcast %15 : vector<1x96xf32> to vector<16x96xf32>
      %17 = arith.addf %14, %16 : vector<16x96xf32>
      %c0_14 = arith.constant 0 : index
      %c0_15 = arith.constant 0 : index
      %18 = vector.load %arg6[%c0_14, %c0_15] : memref<16x96xf32, #tpu.memory_space<vmem>>, vector<16x96xf32>
      tpu.vector_store %arg6[%c0_14, %c0_15], %17 {strides = array<i32>} : memref<16x96xf32, #tpu.memory_space<vmem>>, vector<16x96xf32>,
    } else {
    }
    return
  }
  func.func @transform_0(%arg0: i32, %arg1: i32, %arg2: i32) -> (i32, i32) {
    %c0_i32 = arith.constant 0 : i32
    return %arg0, %arg2 : i32, i32
  }
  func.func @transform_1(%arg0: i32, %arg1: i32, %arg2: i32) -> (i32, i32) {
    %c0_i32 = arith.constant 0 : i32
    return %arg2, %arg1 : i32, i32
  }
  func.func @transform_2(%arg0: i32, %arg1: i32, %arg2: i32) -> (i32, i32) {
    %c0_i32 = arith.constant 0 : i32
    %c0_i32_0 = arith.constant 0 : i32
    return %c0_i32, %arg1 : i32, i32
  }
  func.func @transform_3(%arg0: i32, %arg1: i32, %arg2: i32) -> (i32, i32) {
    %c0_i32 = arith.constant 0 : i32
    return %arg0, %arg1 : i32, i32
  }
}

</mosaic_0001>

<bundles_post_ra>
// kernel: tpu_custom_call.1
= control target key start
LH: loop header
LB: loop body
LE: loop exit
PB: predicated region body
PF: predicated region fallthrough
CT: control target
= control target key end

     0   :  { %8 = vsyncpa [#allocation4], 0  ;;  %s319_s0 = inlined_call_operand.hbm [shape: f32[16,32], index: 0, kind: input, shape index: {}]   ;;  %s320_s1 = inlined_call_operand.hbm [shape: f32[32,96], index: 1, kind: input, shape index: {}]   ;;  %s321_s2 = inlined_call_operand.vmem [shape: f32[1,96], index: 2, kind: input, shape index: {}]   ;;  %s322_s3 = inlined_call_operand.hbm [shape: f32[16,96], index: 3, kind: output, shape index: {}]  }
   0x1   :  { %9 = vsyncpa [#allocation7], 0 }
   0x2   :  { %10 = vsyncpa [#allocation5], 0  ;;  %s238_s12 = smov [#allocation3]   ;;  %s166_s16 = scalar_lea.hbm %s319_s0, 256 }
   0x3   :  { %s16_s13 = sshll.u32 %s238_s12, 4  ;;  %p167_p0 = scmp.ne.s32.totalorder %s319_s0, %s166_s16  ;;  %s17_s13 = int_to_ptr.vmem [resolvable:$true] %s16_s13 }
   0x4   :  { %p170_p1 = scmp.lt.u32.totalorder %s166_s16, %s319_s0 }
   0x6   :  { %p172_p2 = pnand %p170_p1, %p167_p0 }
   0x8   :  { %175 = shalt.err (!%p172_p2)
}
   0x9   :  { %s176_s21 = scalar_lea.vmem %s17_s13, 256  ;;  %p181_p4 = scmp.lt.s32.totalorder %s17_s13, %s17_s13 }
   0xa   :  { %p177_p3 = scmp.ne.s32.totalorder %s17_s13, %s176_s21  ;;  %p182_p5 = scmp.lt.s32.totalorder %s176_s21, %s176_s21 }
   0xc   :  { %p183_p6 = por %p182_p5, %p181_p4 }
   0xe   :  { %p184_p7 = pnand %p183_p6, %p177_p3 }
  0x10   :  { %187 = shalt.err (!%p184_p7)
}
  0x11   :  { %s239_s22 = smov 128   ;;  %s240_s23 = smov 8  }
  0x12   :  { %22 = dma.hbm_to_vmem [thread:$0]  %s319_s0, 256, %s17_s13, [#allocation4], %s239_s22, %s239_s22, %s240_s23  }
  0x13   :  { %s241_s26 = smov [#allocation6]   ;;  %s188_s30 = scalar_lea.hbm %s320_s1, 512 }
  0x14   :  { %s28_s27 = sshll.u32 %s241_s26, 4  ;;  %p189_p8 = scmp.ne.s32.totalorder %s320_s1, %s188_s30  ;;  %s29_s27 = int_to_ptr.vmem [resolvable:$true] %s28_s27 }
  0x15   :  { %p192_p9 = scmp.lt.u32.totalorder %s188_s30, %s320_s1 }
  0x17   :  { %p194_p10 = pnand %p192_p9, %p189_p8 }
  0x19   :  { %197 = shalt.err (!%p194_p10)
}
  0x1a   :  { %s198_s8 = scalar_lea.vmem %s29_s27, 512  ;;  %p203_p12 = scmp.lt.s32.totalorder %s29_s27, %s29_s27 }
  0x1b   :  { %p199_p11 = scmp.ne.s32.totalorder %s29_s27, %s198_s8  ;;  %p204_p13 = scmp.lt.s32.totalorder %s198_s8, %s198_s8 }
  0x1d   :  { %p205_p0 = por %p204_p13, %p203_p12 }
  0x1f   :  { %p206_p1 = pnand %p205_p0, %p199_p11 }
  0x21   :  { %209 = shalt.err (!%p206_p1)
}
  0x22   :  { %34 = dma.hbm_to_vmem [thread:$0]  %s320_s1, 512, %s29_s27, [#allocation7], %s239_s22, %s239_s22, %s240_s23  }
  0x23   :  { %232 = dma.done.wait [#allocation4], 256  }
  0x24   :  { %233 = vsyncadd [#allocation4], 4294967040 }
  0x25   :  { %234 = dma.done.wait [#allocation7], 512  }
  0x26   :  { %235 = vsyncadd [#allocation7], 4294966784  ;;  %vm48_vm0 = vcmask 785408   ;;  %v242_v0 = vmov 0.0   ;;  %vm243_vm1 = vmmov 0   ;;  %v56_v1 = vld [vmem:[#allocation6] sm:$0xff] }
  0x27   :  { %49 = vst.msk [vmem:[#allocation2] sm:$0xff] %vm48_vm0, %v242_v0  ;;  %50 = vst.msk [vmem:[#allocation2 + $0x8] sm:$0xff] %vm48_vm0, %v242_v0  ;;  %151 = vmatprep.subr.bf16.mxu0 %v242_v0  ;;  %155 = vmatprep.mubr.msk.bf16.mxu0 %vm243_vm1, %v242_v0  ;;  %v57_v2 = vld [vmem:[#allocation6 + $0x8] sm:$0xff]  ;;  %v58_v3 = vld [vmem:[#allocation6 + $0x10] sm:$0xff]  ;;  %vm62_vm2 = vcmask 261120   ;;  %s244_s11 = smov [#allocation8]  }
  0x28   :  { %v60_v4 = vpack.c.bf16 %v57_v2, %v56_v1  ;;  %v59_v5 = vld [vmem:[#allocation6 + $0x18] sm:$0xff]  ;;  %v53_v7 = vld [vmem:[#allocation3] sm:$0xff]  ;;  %v147_v18 = vld [vmem:[%s321_s2] ss:$0 sm:$0xff]  ;;  %s133_s12 = sshll.u32 %s244_s11, 4  ;;  %s134_s12 = int_to_ptr.vmem [resolvable:$true] %s133_s12 }
  0x29   :  { %v61_v6 = vpack.c.bf16 %v59_v5, %v58_v3  ;;  %v54_v8 = vld [vmem:[#allocation3 + $0x8] sm:$0xff]  ;;  %s210_s13 = scalar_lea.vmem %s134_s12, 256  ;;  %p215_p3 = scmp.lt.s32.totalorder %s134_s12, %s134_s12 }
  0x2a   :  { %152 = vmatpush3.bf16.msra.mxu0 %v60_v4  ;;  %v55_v9 = vpack.c.bf16 %v54_v8, %v53_v7  ;;  %p211_p2 = scmp.ne.s32.totalorder %s134_s12, %s210_s13  ;;  %p216_p4 = scmp.lt.s32.totalorder %s210_s13, %s210_s13 }
  0x2b   :  { %153 = vmatprep.subr.bf16.mxu0 %v242_v0 }
  0x2c   :  { %p217_p5 = por %p216_p4, %p215_p3 }
  0x2e   :  { %154 = vmatpush3.bf16.msra.mxu0 %v61_v6  ;;  %v51_v10 = vld [vmem:[#allocation2] sm:$0xff]  ;;  %v52_v12 = vld [vmem:[#allocation2 + $0x8] sm:$0xff]  ;;  %p218_p6 = pnand %p217_p5, %p211_p2 }
  0x31   :  { %156 = vmatmul.mubr.msk.bf16.vlgmr.msra.gmra.mrb[0].mxu0 %vm62_vm2, %v55_v9 }
 0x104   :  { %v100_v11 = vpop.f32.mrb[0].mxu0 }
 0x105   :  { %v107_v13 = vadd.f32 %v100_v11, %v51_v10  ;;  %v157_v14 = vpop.f32.mrb[1].mxu0 }
 0x106   :  { %v103_v15 = vpop.f32.mrb[2].mxu0 }
 0x107   :  { %110 = vst.msk [vmem:[#allocation2] sm:$0xff] %vm48_vm0, %v107_v13  ;;  %v108_v16 = vadd.f32 %v103_v15, %v52_v12  ;;  %v158_v17 = vpop.f32.mrb[3].mxu0 }
 0x109   :  { %111 = vst.msk [vmem:[#allocation2 + $0x8] sm:$0xff] %vm48_vm0, %v108_v16 }
 0x10e   :  { %v115_v19 = vld [vmem:[#allocation2] sm:$0xff] }
 0x10f   :  { %v124_v20 = vadd.f32 %v147_v18, %v115_v19 }
 0x110   :  { %v116_v21 = vld [vmem:[#allocation2 + $0x8] sm:$0xff] }
 0x111   :  { %v125_v22 = vadd.f32 %v147_v18, %v116_v21  ;;  %126 = vst.msk [vmem:[#allocation8] sm:$0xff] %vm48_vm0, %v124_v20 }
 0x113   :  { %127 = vst.msk [vmem:[#allocation8 + $0x8] sm:$0xff] %vm48_vm0, %v125_v22 }
 0x114   :  { %221 = shalt.err (!%p218_p6)
}
 0x115   :  { %s222_s15 = scalar_lea.hbm %s322_s3, 256 }
 0x116   :  { %p223_p7 = scmp.ne.s32.totalorder %s322_s3, %s222_s15  ;;  %p226_p8 = scmp.lt.u32.totalorder %s222_s15, %s322_s3 }
 0x118   :  { %p228_p9 = pnand %p226_p8, %p223_p7 }
 0x11a   :  { %231 = shalt.err (!%p228_p9)
}
 0x11b   :  { %139 = dma.vmem_to_hbm [thread:$0]  %s134_s12, 256, %s322_s3, [#allocation5], %s239_s22, %s239_s22, %s240_s23  }
 0x11c   :  { %236 = dma.done.wait [#allocation5], 256  }
 0x11d   :  { %237 = vsyncadd [#allocation5], 4294967040 }
 0x11e   :  { %143 = vsyncpa [#allocation4], 1 }
 0x11f   :  { %144 = vsyncpa [#allocation7], 1 }
 0x120   :  { %145 = vsyncpa [#allocation5], 1 }

</bundles_post_ra>
